<compile_context>
chip_gen: v7x
topology: tpu7x:2x2x1
jax: 0.10.0
libtpu: 0.0.40
codegen_flags: <defaults>
</compile_context>

<pallas_src>
import functools

import jax
import jax.numpy as jnp
from jax.experimental import pallas as pl
from jax.experimental.pallas import tpu as pltpu


_MAX_TILE_B = 16384                      # rows per batch tile (multiple of 128)
_VMEM_X_BUDGET_BYTES = 20 * 1024 * 1024  # budget for the double-buffered x tile
_VMEM_LIMIT_BYTES = 32 * 1024 * 1024     # raise v5e's 16 MiB default scoped VMEM


def _cdiv(a, b):
    return -(-a // b)


def _round_up(n, m):
    return _cdiv(n, m) * m


def _mlp_kernel(x_ref, w1t_ref, b1_ref, w2t_ref, b2_ref, o_ref):
    """One batch tile: fc1 -> ReLU -> fc2 -> softmax, computed transposed.

    x_ref  : (TILE_B, D)   input rows
    w1t_ref: (7, D)        fc1 weight, transposed
    b1_ref : (7, 1)        fc1 bias (column)
    w2t_ref: (3, 7)        fc2 weight, transposed
    b2_ref : (3, 1)        fc2 bias (column)
    o_ref  : (3, TILE_B)   softmax probabilities, transposed (lane-dense store)
    """
    x = x_ref[...]                                          # (TILE_B, D)

    # hT = W1 @ x.T : contract the feature axis of both operands (a @ b.T).
    h = jax.lax.dot_general(
        w1t_ref[...], x,
        dimension_numbers=(((1,), (1,)), ((), ())),
        preferred_element_type=jnp.float32)                 # (7, TILE_B)
    h = jnp.maximum(h + b1_ref[...], 0.0)                   # bias + ReLU

    logits = jnp.dot(w2t_ref[...], h,
                     preferred_element_type=jnp.float32) + b2_ref[...]  # (3, TILE_B)

    # Numerically stable softmax over the class (sublane) axis.
    # Exact divide (not pl.reciprocal(approx=True)): kernel is HBM-bound, the
    # divide is free, and rows must sum to 1 to match torch.softmax tightly.
    m = jnp.max(logits, axis=0, keepdims=True)              # (1, TILE_B)
    e = jnp.exp(logits - m)                                 # (3, TILE_B)
    denom = jnp.sum(e, axis=0, keepdims=True)               # (1, TILE_B)
    o_ref[...] = (e / denom).astype(o_ref.dtype)            # lane-dense store


@functools.partial(jax.jit, static_argnames=("max_tile_b",))
def wc22_mlp_forward(x, w1, b1, w2, b2, *, max_tile_b=_MAX_TILE_B):
    """Forward pass of wc22_MLP.

    x : (B, D) float32
    w1: (D, 7) float32 (transposed vs. PyTorch fc1.weight), b1: (1, 7) or (7,)
    w2: (7, 3) float32 (transposed vs. PyTorch fc2.weight), b2: (1, 3) or (3,)
    Returns (B, 3) float32 softmax probabilities (softmax over dim=1).
    """
    x = x.astype(jnp.float32)
    B, D = x.shape
    H1, H2 = 7, 3

    # Explicit layout contract (easy for callers to get wrong).
    assert w1.shape == (D, H1), f"w1 must be (D,{H1}) = fc1.weight.T, got {w1.shape}"
    assert w2.shape == (H1, H2), f"w2 must be ({H1},{H2}) = fc2.weight.T, got {w2.shape}"
    assert b1.size == H1 and b2.size == H2

    # Kernel-side operands (transposed orientation; biases as columns).
    w1t = jnp.asarray(w1, jnp.float32).T                    # (7, D)
    w2t = jnp.asarray(w2, jnp.float32).T                    # (3, 7)
    b1c = jnp.asarray(b1, jnp.float32).reshape(H1, 1)       # (7, 1)
    b2c = jnp.asarray(b2, jnp.float32).reshape(H2, 1)       # (3, 1)

    # --- Batch tiling: biggest multiple-of-128 tile whose double-buffered,
    # lane-padded x block fits the VMEM budget; no wrapper-side padding of x.
    d_pad = _round_up(D, 128)                               # lane padding in VMEM
    bytes_per_row = d_pad * 4
    cap = max(128, ((_VMEM_X_BUDGET_BYTES // (2 * bytes_per_row)) // 128) * 128)
    tile_b = min(max_tile_b, cap)
    if B <= tile_b:
        tile_b = B            # single full-extent block (legal for any B)
        num_tiles = 1
    else:
        num_tiles = _cdiv(B, tile_b)   # ragged last tile: Pallas boundary masking

    # Advisory cost estimate: this call is memory-bound.
    flops = 2 * B * D * H1 + 2 * B * H1 * H2 + 10 * B
    bytes_accessed = (B * D + B * H2 + D * H1 + H1 + H1 * H2 + H2) * 4
    cost = pl.CostEstimate(flops=flops, transcendentals=H2 * B,
                           bytes_accessed=bytes_accessed)

    out_t = pl.pallas_call(
        _mlp_kernel,
        out_shape=jax.ShapeDtypeStruct((H2, B), jnp.float32),
        grid=(num_tiles,),
        in_specs=[
            pl.BlockSpec((tile_b, D), lambda i: (i, 0)),    # x: tiled over batch
            pl.BlockSpec((H1, D), lambda i: (0, 0)),        # W1^T: resident
            pl.BlockSpec((H1, 1), lambda i: (0, 0)),        # b1:  resident
            pl.BlockSpec((H2, H1), lambda i: (0, 0)),       # W2^T: resident
            pl.BlockSpec((H2, 1), lambda i: (0, 0)),        # b2:  resident
        ],
        out_specs=pl.BlockSpec((H2, tile_b), lambda i: (0, i)),
        compiler_params=pltpu.CompilerParams(
            dimension_semantics=("parallel",),              # megacore on v7x
            vmem_limit_bytes=_VMEM_LIMIT_BYTES,
        ),
        cost_estimate=cost,
    )(x, w1t, b1c, w2t, b2c)

    # (3, B) -> (B, 3): layout plumbing only, kept because the PyTorch module
    # returns batch-major.  Skip this if downstream can consume class-major.
    return out_t.T


def init_params(key, dim_input):
    """Deterministic init mimicking PyTorch nn.Linear default
    (uniform(-1/sqrt(fan_in), 1/sqrt(fan_in)))."""
    k1, k2, k3, k4 = jax.random.split(key, 4)
    bound1 = 1.0 / jnp.sqrt(jnp.float32(dim_input))
    w1 = jax.random.uniform(k1, (dim_input, 7), jnp.float32, -bound1, bound1)
    b1 = jax.random.uniform(k2, (1, 7), jnp.float32, -bound1, bound1)
    bound2 = 1.0 / jnp.sqrt(jnp.float32(7))
    w2 = jax.random.uniform(k3, (7, 3), jnp.float32, -bound2, bound2)
    b2 = jax.random.uniform(k4, (1, 3), jnp.float32, -bound2, bound2)
    return w1, b1, w2, b2


def reference_forward(x, w1, b1, w2, b2):
    h = jnp.maximum(x @ w1 + b1, 0.0)
    logits = h @ w2 + b2
    return jax.nn.softmax(logits, axis=1)


if __name__ == "__main__":
    key = jax.random.PRNGKey(0)
    kp, kx1, kx2, kx3 = jax.random.split(key, 4)

    dim_input = 16
    w1, b1, w2, b2 = init_params(kp, dim_input)

    REF_TOL = 1e-3   # kernel vs. reference (matmul precision differences)
    SUM_TOL = 1e-5   # rows must sum to 1 (exact divide in the kernel)

    def check(batch, kx, **kw):
        x = jax.random.normal(kx, (batch, dim_input), dtype=jnp.float32)
        out = jax.block_until_ready(wc22_mlp_forward(x, w1, b1, w2, b2, **kw))
        ref = reference_forward(x, w1, b1, w2, b2)
        assert out.shape == (batch, 3)
        assert jnp.allclose(out, ref, atol=REF_TOL, rtol=REF_TOL)
        assert jnp.allclose(jnp.sum(out, axis=1), jnp.ones((batch,)), atol=SUM_TOL)

    # Case 1: tiny batch -> single full-extent block (no padding, no grid).
    check(8, kx1)

    # Case 2: multi-tile pipelined grid with a ragged last tile (300 = 2*128 + 44).
    check(300, kx2, max_tile_b=128)

    # Case 3: unaligned batch, single large block (no wrapper pad needed).
    check(2248, kx3)

    print("KERNEL_OK")
</pallas_src>

<mosaic_0001>
module attributes {stable_mosaic.version = 11 : i64} {
  func.func @_mlp_kernel(%arg0: i32, %arg1: memref<8x16xf32, #tpu.memory_space<vmem>>, %arg2: memref<7x16xf32, #tpu.memory_space<vmem>>, %arg3: memref<7x1xf32, #tpu.memory_space<vmem>>, %arg4: memref<3x7xf32, #tpu.memory_space<vmem>>, %arg5: memref<3x1xf32, #tpu.memory_space<vmem>>, %arg6: memref<3x8xf32, #tpu.memory_space<vmem>>) attributes {dimension_semantics = [#tpu.dimension_semantics<parallel>], iteration_bounds = array<i64: 1>, scalar_prefetch = 0 : i64, scratch_operands = 0 : i64, tpu.core_type = #tpu.core_type<tc>, window_params = [{transform_indices = @transform_0, window_bounds = array<i64: 8, 16>}, {pipeline_mode = #tpu.pipeline_mode<synchronous>, transform_indices = @transform_1, window_bounds = array<i64: 7, 16>}, {pipeline_mode = #tpu.pipeline_mode<synchronous>, transform_indices = @transform_2, window_bounds = array<i64: 7, 1>}, {pipeline_mode = #tpu.pipeline_mode<synchronous>, transform_indices = @transform_3, window_bounds = array<i64: 3, 7>}, {pipeline_mode = #tpu.pipeline_mode<synchronous>, transform_indices = @transform_4, window_bounds = array<i64: 3, 1>}, {transform_indices = @transform_5, window_bounds = array<i64: 3, 8>}]} {
    %c0 = arith.constant 0 : index
    %c0_0 = arith.constant 0 : index
    %0 = vector.load %arg1[%c0, %c0_0] : memref<8x16xf32, #tpu.memory_space<vmem>>, vector<8x16xf32>
    %c0_1 = arith.constant 0 : index
    %c0_2 = arith.constant 0 : index
    %1 = vector.load %arg2[%c0_1, %c0_2] : memref<7x16xf32, #tpu.memory_space<vmem>>, vector<7x16xf32>
    %cst = arith.constant dense<0.000000e+00> : vector<7x8xf32>
    %2 = tpu.matmul %1, %0, %cst {dimension_numbers = #tpu.dot_dimension_numbers<[1], [1], [0], [0], [0, 0, 1, 0], [], []>} : vector<7x16xf32>, vector<8x16xf32>, vector<7x8xf32> -> vector<7x8xf32>
    %c0_3 = arith.constant 0 : index
    %c0_4 = arith.constant 0 : index
    %3 = vector.load %arg3[%c0_3, %c0_4] : memref<7x1xf32, #tpu.memory_space<vmem>>, vector<7x1xf32>
    %4 = vector.broadcast %3 : vector<7x1xf32> to vector<7x8xf32>
    %5 = arith.addf %2, %4 : vector<7x8xf32>
    %cst_5 = arith.constant 0.000000e+00 : f32
    %6 = vector.broadcast %cst_5 : f32 to vector<7x8xf32>
    %7 = arith.maximumf %5, %6 : vector<7x8xf32>
    %c0_6 = arith.constant 0 : index
    %c0_7 = arith.constant 0 : index
    %8 = vector.load %arg4[%c0_6, %c0_7] : memref<3x7xf32, #tpu.memory_space<vmem>>, vector<3x7xf32>
    %cst_8 = arith.constant dense<0.000000e+00> : vector<3x8xf32>
    %9 = tpu.matmul %8, %7, %cst_8 {dimension_numbers = #tpu.dot_dimension_numbers<[1], [0], [0], [1], [0, 0, 1, 1], [], []>} : vector<3x7xf32>, vector<7x8xf32>, vector<3x8xf32> -> vector<3x8xf32>
    %c0_9 = arith.constant 0 : index
    %c0_10 = arith.constant 0 : index
    %10 = vector.load %arg5[%c0_9, %c0_10] : memref<3x1xf32, #tpu.memory_space<vmem>>, vector<3x1xf32>
    %11 = vector.broadcast %10 : vector<3x1xf32> to vector<3x8xf32>
    %12 = arith.addf %9, %11 : vector<3x8xf32>
    %cst_11 = arith.constant dense<0xFF800000> : vector<8xf32>
    %13 = vector.multi_reduction <maximumf>, %12, %cst_11 [0] : vector<3x8xf32> to vector<8xf32>
    %14 = vector.shape_cast %13 : vector<8xf32> to vector<1x8xf32>
    %15 = vector.broadcast %14 : vector<1x8xf32> to vector<3x8xf32>
    %16 = arith.subf %12, %15 : vector<3x8xf32>
    %17 = math.exp %16 : vector<3x8xf32>
    %cst_12 = arith.constant dense<0.000000e+00> : vector<8xf32>
    %18 = vector.multi_reduction <add>, %17, %cst_12 [0] : vector<3x8xf32> to vector<8xf32>
    %19 = vector.shape_cast %18 : vector<8xf32> to vector<1x8xf32>
    %20 = vector.broadcast %19 : vector<1x8xf32> to vector<3x8xf32>
    %21 = arith.divf %17, %20 : vector<3x8xf32>
    %c0_13 = arith.constant 0 : index
    %c0_14 = arith.constant 0 : index
    %22 = vector.load %arg6[%c0_13, %c0_14] : memref<3x8xf32, #tpu.memory_space<vmem>>, vector<3x8xf32>
    tpu.vector_store %arg6[%c0_13, %c0_14], %21 {strides = array<i32>} : memref<3x8xf32, #tpu.memory_space<vmem>>, vector<3x8xf32>,
    return
  }
  func.func @transform_0(%arg0: i32) -> (i32, i32) {
    %c0_i32 = arith.constant 0 : i32
    %c0_i32_0 = arith.constant 0 : i32
    return %arg0, %c0_i32 : i32, i32
  }
  func.func @transform_1(%arg0: i32) -> (i32, i32) {
    %c0_i32 = arith.constant 0 : i32
    %c0_i32_0 = arith.constant 0 : i32
    %c0_i32_1 = arith.constant 0 : i32
    return %c0_i32, %c0_i32_0 : i32, i32
  }
  func.func @transform_2(%arg0: i32) -> (i32, i32) {
    %c0_i32 = arith.constant 0 : i32
    %c0_i32_0 = arith.constant 0 : i32
    %c0_i32_1 = arith.constant 0 : i32
    return %c0_i32, %c0_i32_0 : i32, i32
  }
  func.func @transform_3(%arg0: i32) -> (i32, i32) {
    %c0_i32 = arith.constant 0 : i32
    %c0_i32_0 = arith.constant 0 : i32
    %c0_i32_1 = arith.constant 0 : i32
    return %c0_i32, %c0_i32_0 : i32, i32
  }
  func.func @transform_4(%arg0: i32) -> (i32, i32) {
    %c0_i32 = arith.constant 0 : i32
    %c0_i32_0 = arith.constant 0 : i32
    %c0_i32_1 = arith.constant 0 : i32
    return %c0_i32, %c0_i32_0 : i32, i32
  }
  func.func @transform_5(%arg0: i32) -> (i32, i32) {
    %c0_i32 = arith.constant 0 : i32
    %c0_i32_0 = arith.constant 0 : i32
    return %c0_i32, %arg0 : i32, i32
  }
}

</mosaic_0001>

<bundles_post_ra>
// kernel: wc22_mlp_forward.1
= control target key start
LH: loop header
LB: loop body
LE: loop exit
PB: predicated region body
PF: predicated region fallthrough
CT: control target
= control target key end

     0   :  { %vm29_vm0 = vcmask 130048   ;;  %v278_v1 = vmov 0.0   ;;  %vm279_vm1 = vmmov 0   ;;  %v280_v4 = vmov 0   ;;  %s342_s0 = inlined_call_operand.vmem [shape: f32[8,16], index: 0, kind: input, shape index: {}]   ;;  %s343_s1 = inlined_call_operand.vmem [shape: f32[7,16], index: 1, kind: input, shape index: {}]   ;;  %s344_s2 = inlined_call_operand.vmem [shape: f32[7,1], index: 2, kind: input, shape index: {}]   ;;  %s345_s3 = inlined_call_operand.vmem [shape: f32[3,7], index: 3, kind: input, shape index: {}]   ;;  %s346_s4 = inlined_call_operand.vmem [shape: f32[3,1], index: 4, kind: input, shape index: {}]   ;;  %s347_s5 = inlined_call_operand.hbm [shape: f32[3,8], index: 5, kind: output, shape index: {}]  }
   0x1   :  { %v21_v0 = vld [vmem:[%s342_s0] sm:$0xff]  ;;  %235 = vmatprep.subr.mxu0 %v278_v1  ;;  %237 = vmatprep.mubr.msk.f32.mxu0 %vm279_vm1, %v278_v1 }
   0x2   :  { %v23_v2 = vld [vmem:[%s344_s2] sm:$0x7f]  ;;  %236 = vmatpush3.xpose.msk.msra.mxu0 %vm29_vm0, %v21_v0  ;;  %249 = vset.pattern.permute.xlu0 %v280_v4 }
   0x3   :  { %v22_v3 = vld [vmem:[%s343_s1] sm:$0x7f] }
   0x4   :  { %10 = vsyncpa [#allocation3], 0  ;;  %26 = vperm.xlu0 %249, %v23_v2   ;;  %240 = vmatprep.subr.mxu1 %v278_v1  ;;  %v108_v5 = vld [vmem:[%s346_s4] sm:$0x7]  ;;  %vm118_vm2 = vcmask 1046528   ;;  %vm114_vm3 = vcmask 56320  }
   0x5   :  { %242 = vmatprep.mubr.msk.f32.mxu1 %vm279_vm1, %v278_v1  ;;  %238 = vmatmul.mubr.msk.f32.vlgmr.msra.gmra.mrb[0].mxu0 %vm29_vm0, %v22_v3  ;;  %v107_v11 = vld [vmem:[%s345_s3] sm:$0x7]  ;;  %vm192_vm4 = vcmask 59392   ;;  %s281_s3 = smov [#allocation2]  }
   0x6   :  { %s219_s4 = sshll.u32 %s281_s3, 4  ;;  %s220_s4 = int_to_ptr.vmem [resolvable:$true] %s219_s4 }
   0x7   :  { %s254_s25 = scalar_lea.vmem %s220_s4, 64  ;;  %p259_p1 = scmp.lt.s32.totalorder %s220_s4, %s220_s4 }
   0x8   :  { %111 = vperm.xlu0 %249, %v108_v5   ;;  %p255_p0 = scmp.ne.s32.totalorder %s220_s4, %s254_s25  ;;  %p260_p2 = scmp.lt.s32.totalorder %s254_s25, %s254_s25 }
   0xa   :  { %p261_p3 = por %p260_p2, %p259_p1 }
   0xc   :  { %p262_p4 = pnand %p261_p3, %p255_p0 }
  0x83   :  { %v27_v6 = vpop.permute.xlu0 %26 }
  0x87   :  { %v112_v12 = vpop.permute.xlu0 %111 }
  0xd8   :  { %v102_v7 = vpop.f32.mrb[0].mxu0 }
  0xd9   :  { %v103_v8 = vadd.f32 %v102_v7, %v27_v6  ;;  %v239_v9 = vpop.f32.mrb[1].mxu0 }
  0xdb   :  { %v106_v10 = vmax.f32 %v103_v8, 0.0 }
  0xdd   :  { %241 = vmatpush3.msk.msra.mxu1 %vm118_vm2, %v106_v10 }
  0xde   :  { %243 = vmatmul.mubr.msk.f32.vlgmr.msra.gmra.mrb[0].mxu1 %vm114_vm3, %v107_v11 }
 0x1b1   :  { %v188_v13 = vpop.f32.mrb[0].mxu1 }
 0x1b2   :  { %v189_v14 = vadd.f32 %v188_v13, %v112_v12  ;;  %v244_v15 = vpop.f32.mrb[1].mxu1 }
 0x1b4   :  { %v193_v16 = vsel %vm192_vm4, %v189_v14, -inf }
 0x1b5   :  { %v194_v17 = vrot.slane %v193_v16, 4 }
 0x1b7   :  { %v195_v18 = vmax.f32 %v193_v16, %v194_v17 }
 0x1b9   :  { %v196_v19 = vrot.slane %v195_v18, 2 }
 0x1bb   :  { %v197_v20 = vmax.f32 %v195_v18, %v196_v19 }
 0x1bd   :  { %v198_v21 = vrot.slane %v197_v20, 1 }
 0x1bf   :  { %v199_v22 = vmax.f32 %v197_v20, %v198_v21 }
 0x1c1   :  { %v200_v23 = vsub.f32 %v189_v14, %v199_v22 }
 0x1c3   :  { %v201_v24 = vmul.f32 1.442695, %v200_v23 }
 0x1c5   :  { %250 = vpow2.f32 %v201_v24 }
 0x1cf   :  { %v251_v25 = vpop.eup %250 }
 0x1d0   :  { %v203_v26 = vsel %vm192_vm4, %v251_v25, 0.0 }
 0x1d1   :  { %v204_v27 = vrot.slane %v203_v26, 4 }
 0x1d3   :  { %v205_v28 = vadd.f32 %v204_v27, %v203_v26 }
 0x1d5   :  { %v206_v29 = vrot.slane %v205_v28, 2 }
 0x1d7   :  { %v207_v30 = vadd.f32 %v206_v29, %v205_v28 }
 0x1d9   :  { %v208_v31 = vrot.slane %v207_v30, 1 }
 0x1db   :  { %v209_v32 = vadd.f32 %v208_v31, %v207_v30 }
 0x1dd   :  { %252 = vrcp.f32 %v209_v32 }
 0x1e7   :  { %v253_v33 = vpop.eup %252 }
 0x1e8   :  { %v211_v34 = vmul.f32 %v253_v33, %v251_v25 }
 0x1ea   :  { %212 = vst.msk [vmem:[#allocation2] sm:$0x7] %vm192_vm4, %v211_v34 }
 0x1eb   :  { %265 = shalt.err (!%p262_p4)
}
 0x1ec   :  { %s266_s28 = scalar_lea.hbm %s347_s5, 64 }
 0x1ed   :  { %p267_p5 = scmp.ne.s32.totalorder %s347_s5, %s266_s28  ;;  %p270_p6 = scmp.lt.u32.totalorder %s266_s28, %s347_s5 }
 0x1ef   :  { %p272_p7 = pnand %p270_p6, %p267_p5 }
 0x1f1   :  { %275 = shalt.err (!%p272_p7)
}
 0x1f2   :  { %222 = dma.vmem_to_hbm [thread:$0]  %s220_s4, 64, %s347_s5, [#allocation3]  }
 0x1f3   :  { %276 = dma.done.wait [#allocation3], 64  }
 0x1f4   :  { %277 = vsyncadd [#allocation3], 4294967232 }
 0x1f5   :  { %226 = vsyncpa [#allocation3], 1 }

</bundles_post_ra>
